<compile_context>
chip_gen: v7x
topology: tpu7x:2x2x1
jax: 0.10.0
libtpu: 0.0.40
codegen_flags: <defaults>
</compile_context>

<pallas_src>
import jax
import jax.numpy as jnp
from jax.experimental import pallas as pl
from jax.experimental.pallas import tpu as pltpu


_LANE = 128
_COL_CANDIDATES = (8192, 4096, 2048, 1024, 512, 256, 128)


def _scale_kernel(factor_ref, x_ref, o_ref):
    # factor_ref: (1,) f32 in SMEM -> one scalar load on the (free) scalar slot.
    # Multiply in f32, then cast to the output dtype (promote-then-cast).
    f = factor_ref[0]
    o_ref[...] = (x_ref[...].astype(jnp.float32) * f).astype(o_ref.dtype)


def _sublane_multiple(itemsize):
    # Native sublane tiling: 8 for 32-bit, 16 for 16-bit, 32 for 8-bit dtypes.
    return 8 * max(1, 4 // max(1, itemsize))


def _round_up(a, m):
    return ((a + m - 1) // m) * m


def _choose_lane_dense_cols(total, min_rows):
    # Largest multiple-of-128 width dividing the element count, preferring one
    # that also yields sublane-dense (>= min_rows) rows.
    for c in _COL_CANDIDATES:
        if total % c == 0 and total // c >= min_rows:
            return c
    for c in _COL_CANDIDATES:
        if total % c == 0:
            return c
    return None


def _target_block_bytes():
    # ~4 MiB blocks on 128 MiB-VMEM parts (v5e/v6e), ~2 MiB on 64 MiB parts
    # (v7x): 2 arrays x 2 pipeline buffers always stay well inside scoped VMEM.
    try:
        vmem = pltpu.get_tpu_info().vmem_capacity_bytes
    except Exception:
        vmem = 64 * 1024 * 1024
    return max(512 * 1024, min(4 * 1024 * 1024, vmem // 32))


def scale(x: jax.Array, factor: float, *, donate: bool = False) -> jax.Array:
    """Pallas equivalent of torch.mul(x, factor)."""
    orig_shape = x.shape
    total = x.size
    if total == 0:
        return x

    itemsize = jnp.dtype(x.dtype).itemsize
    sublane = _sublane_multiple(itemsize)

    if jnp.issubdtype(x.dtype, jnp.floating):
        out_dtype = x.dtype
    else:
        # torch.mul(int_tensor, python_float) promotes to float.
        out_dtype = jnp.float32

    # --- lane-dense re-slab of the flattened tensor --------------------------
    cols = _choose_lane_dense_cols(total, sublane)
    if cols is not None:
        x2 = x.reshape(total // cols, cols)
    elif x.ndim >= 2:
        x2 = x.reshape(-1, orig_shape[-1])  # fallback: original scheme
    else:
        x2 = x.reshape(1, total)
    rows, cols = x2.shape

    target_bytes = _target_block_bytes()

    # --- column tile: multiple of 128 dividing cols (else whole cols) --------
    tile_cols = cols
    if cols % _LANE == 0:
        for tc in _COL_CANDIDATES:
            if cols % tc == 0 and tc * itemsize <= target_bytes:
                tile_cols = tc
                break

    # --- row tile: byte budget rounded to the sublane multiple ---------------
    tile_rows = target_bytes // max(1, tile_cols * itemsize)
    tile_rows = max(sublane, (tile_rows // sublane) * sublane)
    tile_rows = min(tile_rows, rows)

    # Give v7x's two TensorCores at least two "parallel" row steps when possible.
    if pl.cdiv(rows, tile_rows) == 1 and rows >= 2 * sublane:
        tile_rows = max(sublane, _round_up(pl.cdiv(rows, 2), sublane))

    grid = (pl.cdiv(rows, tile_rows), pl.cdiv(cols, tile_cols))

    factor_arr = jnp.asarray([factor], dtype=jnp.float32)

    io_aliases = {}
    if donate and out_dtype == x2.dtype:
        # x is input index 1 (SMEM factor is input 0). Only beneficial when the
        # caller actually donates x; otherwise XLA inserts a protective copy.
        io_aliases = {1: 0}

    out2 = pl.pallas_call(
        _scale_kernel,
        out_shape=jax.ShapeDtypeStruct((rows, cols), out_dtype),
        grid_spec=pltpu.PrefetchScalarGridSpec(
            num_scalar_prefetch=0,
            grid=grid,
            in_specs=[
                pl.BlockSpec(memory_space=pltpu.MemorySpace.SMEM),        # factor
                pl.BlockSpec((tile_rows, tile_cols), lambda i, j: (i, j)),  # x
            ],
            out_specs=pl.BlockSpec((tile_rows, tile_cols), lambda i, j: (i, j)),
        ),
        compiler_params=pltpu.CompilerParams(
            dimension_semantics=("parallel", "parallel"),
        ),
        input_output_aliases=io_aliases,
    )(factor_arr, x2)

    return out2.reshape(orig_shape)


if __name__ == "__main__":
    key = jax.random.PRNGKey(0)
    factor = 361.0

    # Primary case: small NCHW-ish tensor, as the Scale module would see.
    x = jax.random.normal(key, (2, 4, 16, 16), dtype=jnp.float32)
    out = scale(x, factor)
    jax.block_until_ready(out)
    assert out.shape == x.shape and out.dtype == x.dtype
    assert jnp.allclose(out, x * factor, rtol=1e-6, atol=1e-6)

    # Exercise the multi-step lane-dense path (grid split across row tiles).
    x_big = jax.random.normal(jax.random.PRNGKey(1), (16, 64, 128), dtype=jnp.float32)
    out_big = scale(x_big, 0.5)
    jax.block_until_ready(out_big)
    assert jnp.allclose(out_big, x_big * 0.5, rtol=1e-6, atol=1e-6)

    # Exercise the non-128-divisible fallback path (full-extent block).
    x_odd = jax.random.normal(jax.random.PRNGKey(2), (3, 5, 33), dtype=jnp.float32)
    out_odd = scale(x_odd, -2.25)
    jax.block_until_ready(out_odd)
    assert jnp.allclose(out_odd, x_odd * -2.25, rtol=1e-6, atol=1e-6)

    print("KERNEL_OK")
</pallas_src>

<mosaic_0001>
module attributes {stable_mosaic.version = 11 : i64} {
  func.func @_scale_kernel(%arg0: i32, %arg1: i32, %arg2: memref<1xf32, #tpu.memory_space<smem>>, %arg3: memref<8x256xf32, #tpu.memory_space<vmem>>, %arg4: memref<8x256xf32, #tpu.memory_space<vmem>>) attributes {dimension_semantics = [#tpu.dimension_semantics<parallel>, #tpu.dimension_semantics<parallel>], iteration_bounds = array<i64: 1, 1>, scalar_prefetch = 0 : i64, scratch_operands = 0 : i64, tpu.core_type = #tpu.core_type<tc>, window_params = [{transform_indices = @transform_0, window_bounds = array<i64: 1>}, {transform_indices = @transform_1, window_bounds = array<i64: 8, 256>}, {transform_indices = @transform_2, window_bounds = array<i64: 8, 256>}]} {
    %c0 = arith.constant 0 : index
    %0 = memref.load %arg2[%c0] : memref<1xf32, #tpu.memory_space<smem>>
    %c0_0 = arith.constant 0 : index
    %c0_1 = arith.constant 0 : index
    %1 = vector.load %arg3[%c0_0, %c0_1] : memref<8x256xf32, #tpu.memory_space<vmem>>, vector<8x256xf32>
    %2 = vector.broadcast %0 : f32 to vector<8x256xf32>
    %3 = arith.mulf %1, %2 : vector<8x256xf32>
    %c0_2 = arith.constant 0 : index
    %c0_3 = arith.constant 0 : index
    %4 = vector.load %arg4[%c0_2, %c0_3] : memref<8x256xf32, #tpu.memory_space<vmem>>, vector<8x256xf32>
    tpu.vector_store %arg4[%c0_2, %c0_3], %3 {strides = array<i32>} : memref<8x256xf32, #tpu.memory_space<vmem>>, vector<8x256xf32>,
    return
  }
  func.func @transform_0(%arg0: i32, %arg1: i32) -> i32 {
    %c0_i32 = arith.constant 0 : i32
    %c0_i32_0 = arith.constant 0 : i32
    return %c0_i32 : i32
  }
  func.func @transform_1(%arg0: i32, %arg1: i32) -> (i32, i32) {
    %c0_i32 = arith.constant 0 : i32
    return %arg0, %arg1 : i32, i32
  }
  func.func @transform_2(%arg0: i32, %arg1: i32) -> (i32, i32) {
    %c0_i32 = arith.constant 0 : i32
    return %arg0, %arg1 : i32, i32
  }
}

</mosaic_0001>

<bundles_post_ra>
// kernel: tpu_custom_call.1
= control target key start
LH: loop header
LB: loop body
LE: loop exit
PB: predicated region body
PF: predicated region fallthrough
CT: control target
= control target key end

     0   :  { %8 = vsyncpa [#allocation4], 0  ;;  %s142_s0 = inlined_call_operand.<no memory space> [shape: f32[1], index: 0, kind: input, shape index: {}]   ;;  %s143_s1 = inlined_call_operand.hbm [shape: f32[8,256], index: 1, kind: input, shape index: {}]   ;;  %s144_s2 = inlined_call_operand.hbm [shape: f32[8,256], index: 2, kind: output, shape index: {}]  }
   0x1   :  { %9 = vsyncpa [#allocation5], 0  ;;  %s98_s9 = smov [#allocation3]   ;;  %s50_s13 = scalar_lea.hbm %s143_s1, 256 }
   0x2   :  { %s18_s10 = sshll.u32 %s98_s9, 4  ;;  %p51_p0 = scmp.ne.s32.totalorder %s143_s1, %s50_s13  ;;  %s19_s10 = int_to_ptr.vmem [resolvable:$true] %s18_s10 }
   0x3   :  { %p54_p1 = scmp.lt.u32.totalorder %s50_s13, %s143_s1 }
   0x5   :  { %p56_p2 = pnand %p54_p1, %p51_p0 }
   0x7   :  { %59 = shalt.err (!%p56_p2)
}
   0x8   :  { %s60_s18 = scalar_lea.vmem %s19_s10, 256  ;;  %p65_p4 = scmp.lt.s32.totalorder %s19_s10, %s19_s10 }
   0x9   :  { %p61_p3 = scmp.ne.s32.totalorder %s19_s10, %s60_s18  ;;  %p66_p5 = scmp.lt.s32.totalorder %s60_s18, %s60_s18 }
   0xb   :  { %p67_p6 = por %p66_p5, %p65_p4 }
   0xd   :  { %p68_p7 = pnand %p67_p6, %p61_p3 }
   0xf   :  { %71 = shalt.err (!%p68_p7)
}
  0x10   :  { %21 = dma.hbm_to_vmem [thread:$0]  %s143_s1, 256, %s19_s10, [#allocation4]  }
  0x11   :  { %94 = dma.done.wait [#allocation4], 256  }
  0x12   :  { %95 = vsyncadd [#allocation4], 4294967040  ;;  %v28_v0 = vstv %s142_s0  ;;  %s99_s23 = smov [#allocation6]   ;;  %v26_v1 = vld [vmem:[#allocation3] sm:$0xff]  ;;  %v27_v2 = vld [vmem:[#allocation3 + $0x8] sm:$0xff] }
  0x13   :  { %s39_s24 = sshll.u32 %s99_s23, 4  ;;  %v29_v3 = vmul.f32 %v28_v0, %v26_v1  ;;  %v30_v4 = vmul.f32 %v28_v0, %v27_v2  ;;  %s40_s24 = int_to_ptr.vmem [resolvable:$true] %s39_s24 }
  0x14   :  { %s72_s25 = scalar_lea.vmem %s40_s24, 256  ;;  %p77_p9 = scmp.lt.s32.totalorder %s40_s24, %s40_s24 }
  0x15   :  { %31 = vst [vmem:[#allocation6] sm:$0xff] %v29_v3  ;;  %32 = vst [vmem:[#allocation6 + $0x8] sm:$0xff] %v30_v4  ;;  %p73_p8 = scmp.ne.s32.totalorder %s40_s24, %s72_s25  ;;  %p78_p10 = scmp.lt.s32.totalorder %s72_s25, %s72_s25 }
  0x17   :  { %p79_p11 = por %p78_p10, %p77_p9 }
  0x19   :  { %p80_p12 = pnand %p79_p11, %p73_p8 }
  0x1b   :  { %83 = shalt.err (!%p80_p12)
}
  0x1c   :  { %s84_s0 = scalar_lea.hbm %s144_s2, 256 }
  0x1d   :  { %p85_p13 = scmp.ne.s32.totalorder %s144_s2, %s84_s0  ;;  %p88_p0 = scmp.lt.u32.totalorder %s84_s0, %s144_s2 }
  0x1f   :  { %p90_p1 = pnand %p88_p0, %p85_p13 }
  0x21   :  { %93 = shalt.err (!%p90_p1)
}
  0x22   :  { %42 = dma.vmem_to_hbm [thread:$0]  %s40_s24, 256, %s144_s2, [#allocation5]  }
  0x23   :  { %96 = dma.done.wait [#allocation5], 256  }
  0x24   :  { %97 = vsyncadd [#allocation5], 4294967040 }
  0x25   :  { %46 = vsyncpa [#allocation4], 1 }
  0x26   :  { %47 = vsyncpa [#allocation5], 1 }

</bundles_post_ra>
